<compile_context>
chip_gen: v7x
topology: tpu7x:2x2x1
jax: 0.10.0
libtpu: 0.0.40
codegen_flags: <defaults>
</compile_context>

<pallas_src>
import functools
import math

import jax
import jax.numpy as jnp
from jax.experimental import pallas as pl
from jax.experimental.pallas import tpu as pltpu

PATH_IN = 1024        # size_dict_path['small'][0]
HID = 256             # size_dict_path['small'][1] == [2]
GENO_HID = 1024       # size_dict_geno['small'][0]
N_CLASSES = 4
MEM_SIZE = 32
MEM_DIM = 256
N_HEAD = 4
HEAD_DIM = HID // N_HEAD
TEMPERATURE = 0.5
LN_EPS = 1e-5


# ----------------------------------------------------------------------------
# Kernel 1: path_proj (Linear 1024->256 [bf16 MXU operands, f32 acc], ReLU,
#           LayerNorm in f32) fused with the mean-pool over instances
#           (pathMIL TransMIL effective output).
# ----------------------------------------------------------------------------
def _path_proj_pool_kernel(n_inst, x_ref, w_ref, b_ref, g_ref, beta_ref,
                           o_ref, acc_ref):
    n = pl.program_id(1)

    @pl.when(n == 0)
    def _():
        acc_ref[...] = jnp.zeros_like(acc_ref)

    x = x_ref[0]                                                   # (TN, 1024) bf16
    # bf16 x bf16 -> f32 accumulate on the MXU.
    h = jnp.dot(x, w_ref[...], preferred_element_type=jnp.float32) + b_ref[...]
    h = jnp.maximum(h, 0.0)                                        # ReLU (f32)
    # LayerNorm(256), f32 epilogue, two lane reductions + one rsqrt.
    inv_d = 1.0 / float(HID)
    mu = jnp.sum(h, axis=-1, keepdims=True) * inv_d
    var = jnp.sum(h * h, axis=-1, keepdims=True) * inv_d - mu * mu
    hn = (h - mu) * jax.lax.rsqrt(var + LN_EPS)
    hn = hn * g_ref[...] + beta_ref[...]
    acc_ref[...] += jnp.sum(hn, axis=0, keepdims=True)             # pool accumulator

    @pl.when(n == pl.num_programs(1) - 1)
    def _():
        o_ref[0] = (acc_ref[...] * (1.0 / float(n_inst))).astype(o_ref.dtype)


def path_proj_and_pool(x_path, w, b, gamma, beta, *, tile_n=256):
    """x_path: (B, N, 1024) bf16, w: (1024, 256) bf16 -> (B, 256) f32."""
    B, N, d_in = x_path.shape
    tile_n = min(tile_n, N)
    assert N % tile_n == 0 and (tile_n % 8 == 0 or tile_n == N), (N, tile_n)
    out = pl.pallas_call(
        functools.partial(_path_proj_pool_kernel, N),
        out_shape=jax.ShapeDtypeStruct((B, 1, HID), jnp.float32),
        grid_spec=pltpu.PrefetchScalarGridSpec(
            num_scalar_prefetch=0,
            grid=(B, N // tile_n),
            in_specs=[
                pl.BlockSpec((1, tile_n, d_in), lambda bi, ni: (bi, ni, 0)),
                pl.BlockSpec((d_in, HID), lambda bi, ni: (0, 0)),
                pl.BlockSpec((1, HID), lambda bi, ni: (0, 0)),
                pl.BlockSpec((1, HID), lambda bi, ni: (0, 0)),
                pl.BlockSpec((1, HID), lambda bi, ni: (0, 0)),
            ],
            out_specs=pl.BlockSpec((1, 1, HID), lambda bi, ni: (bi, 0, 0)),
            scratch_shapes=[pltpu.VMEM((1, HID), jnp.float32)],
        ),
        compiler_params=pltpu.CompilerParams(
            dimension_semantics=("parallel", "arbitrary")),
    )(x_path, w, b, gamma, beta)
    return out[:, 0, :]                                            # (B, 256)


# ----------------------------------------------------------------------------
# Kernel 2 (fused tail): geno SNN (Linear+ELU -> Linear+ELU), two cross-modal
# prototype reads (batched 4-head attention against the prototype banks),
# modality averaging, split-weight fusion MLP, classifier.  Single pallas_call,
# everything VMEM-resident, no grid.
# ----------------------------------------------------------------------------
def _tail_kernel(x_omic_ref, h_path_ref,
                 snn_w1, snn_b1, snn_w2, snn_b2,
                 pbank, gbank,
                 p_wq, p_bq, p_wk, p_bk, p_wv, p_bv, p_wo, p_bo,
                 g_wq, g_bq, g_wk, g_bk, g_wv, g_bv, g_wo, g_bo,
                 mm_w1a, mm_w1b, mm_b1, mm_w2, mm_b2, clf_w, clf_b,
                 o_ref):

    def elu(v):
        return jnp.where(v > 0, v, jnp.expm1(v))

    # --- geno SNN (eval mode; AlphaDropout is identity) ---
    xg = x_omic_ref[...]
    hg = elu(jnp.dot(xg, snn_w1[...], preferred_element_type=jnp.float32)
             + snn_b1[...])
    h_geno = elu(jnp.dot(hg, snn_w2[...], preferred_element_type=jnp.float32)
                 + snn_b2[...])

    h_path = h_path_ref[...]

    scale = 1.0 / (math.sqrt(HEAD_DIM) * TEMPERATURE)

    def mha_read(q, kv, wq, bq, wk, bk, wv, bv, wo, bo):
        Bq = q.shape[0]
        M = kv.shape[0]
        # Fold the softmax scale into Q once (one (B,256) vmul total).
        Q = (jnp.dot(q, wq[...], preferred_element_type=jnp.float32)
             + bq[...]) * scale
        K = jnp.dot(kv, wk[...], preferred_element_type=jnp.float32) + bk[...]
        V = jnp.dot(kv, wv[...], preferred_element_type=jnp.float32) + bv[...]
        Qh = Q.reshape(Bq, N_HEAD, HEAD_DIM)
        Kh = K.reshape(M, N_HEAD, HEAD_DIM)
        Vh = V.reshape(M, N_HEAD, HEAD_DIM)
        # scores: batch over heads -> (H, B, M)
        s = jax.lax.dot_general(Qh, Kh, (((2,), (2,)), ((1,), (1,))),
                                preferred_element_type=jnp.float32)
        s = s - jnp.max(s, axis=-1, keepdims=True)
        p = jnp.exp(s)
        p = p * pl.reciprocal(jnp.sum(p, axis=-1, keepdims=True), approx=True)
        # context: (H, B, D)
        o = jax.lax.dot_general(p, Vh, (((2,), (0,)), ((0,), (1,))),
                                preferred_element_type=jnp.float32)
        o = jnp.transpose(o, (1, 0, 2)).reshape(Bq, HID)            # (B, 256)
        return jnp.dot(o, wo[...], preferred_element_type=jnp.float32) + bo[...]

    # path read: query = geno embedding, keys/values = path prototype bank
    h_path_read = mha_read(h_geno, pbank[...],
                           p_wq, p_bq, p_wk, p_bk, p_wv, p_bv, p_wo, p_bo)
    # geno read: query = path embedding, keys/values = geno prototype bank
    h_geno_read = mha_read(h_path, gbank[...],
                           g_wq, g_bq, g_wk, g_bk, g_wv, g_bv, g_wo, g_bo)

    h_path_avg = (h_path + h_path_read) * 0.5
    h_geno_avg = (h_geno + h_geno_read) * 0.5

    # concat fusion without the 512-lane concat: split W1 into two 256x256 halves.
    h = (jnp.dot(h_path_avg, mm_w1a[...], preferred_element_type=jnp.float32)
         + jnp.dot(h_geno_avg, mm_w1b[...], preferred_element_type=jnp.float32)
         + mm_b1[...])
    h = jnp.maximum(h, 0.0)
    h = jnp.maximum(
        jnp.dot(h, mm_w2[...], preferred_element_type=jnp.float32) + mm_b2[...],
        0.0)
    logits = jnp.dot(h, clf_w[...],
                     preferred_element_type=jnp.float32) + clf_b[...]
    o_ref[...] = logits.astype(o_ref.dtype)


def tail_fused(h_path, x_omic_flat, params):
    B = h_path.shape[0]
    args = (x_omic_flat, h_path,
            params['snn_w1'], params['snn_b1'],
            params['snn_w2'], params['snn_b2'],
            params['pbank_flat'], params['gbank_flat'],
            *params['mha_path'], *params['mha_geno'],
            params['mm_w1a'], params['mm_w1b'], params['mm_b1'],
            params['mm_w2'], params['mm_b2'],
            params['clf_w'], params['clf_b'])
    return pl.pallas_call(
        _tail_kernel,
        out_shape=jax.ShapeDtypeStruct((B, N_CLASSES), jnp.float32),
        in_specs=[pl.BlockSpec(memory_space=pltpu.MemorySpace.VMEM)
                  for _ in args],
        out_specs=pl.BlockSpec(memory_space=pltpu.MemorySpace.VMEM),
    )(*args)


# ----------------------------------------------------------------------------
# Parameter init (deterministic, synthetic) + forward glue
# ----------------------------------------------------------------------------
def init_params(key, omic_dim):
    keys = iter(jax.random.split(key, 40))

    def xavier(shape):
        fan_in, fan_out = shape[-2], shape[-1]
        lim = math.sqrt(6.0 / (fan_in + fan_out))
        return jax.random.uniform(next(keys), shape, jnp.float32, -lim, lim)

    def zeros(shape):
        return jnp.zeros(shape, jnp.float32)

    p = {}
    # path_proj: Linear(1024,256) + ReLU + LayerNorm(256)
    p['path_w'] = xavier((PATH_IN, HID))
    p['path_b'] = zeros((1, HID))
    p['path_gamma'] = jnp.ones((1, HID), jnp.float32)
    p['path_beta'] = zeros((1, HID))
    # geno SNN: Linear(omic,1024)+ELU, Linear(1024,256)+ELU
    p['snn_w1'] = xavier((omic_dim, GENO_HID))
    p['snn_b1'] = zeros((1, GENO_HID))
    p['snn_w2'] = xavier((GENO_HID, HID))
    p['snn_b2'] = zeros((1, HID))
    # prototype banks (n_classes, memory_size, memory_dim), used flattened
    p['pbank_flat'] = xavier((N_CLASSES, MEM_SIZE, MEM_DIM)).reshape(
        N_CLASSES * MEM_SIZE, MEM_DIM)
    p['gbank_flat'] = xavier((N_CLASSES, MEM_SIZE, MEM_DIM)).reshape(
        N_CLASSES * MEM_SIZE, MEM_DIM)

    # MultiheadAttention (q/k/v/out projections, 4 heads, embed=256)
    def mha_params():
        return (xavier((HID, HID)), zeros((1, HID)),       # Wq, bq
                xavier((MEM_DIM, HID)), zeros((1, HID)),   # Wk, bk
                xavier((MEM_DIM, HID)), zeros((1, HID)),   # Wv, bv
                xavier((HID, HID)), zeros((1, HID)))       # Wo, bo

    p['mha_path'] = mha_params()   # path_intra_read_attn
    p['mha_geno'] = mha_params()   # geno_intra_read_attn

    # concat fusion mm: Linear(512,256)+ReLU, Linear(256,256)+ReLU
    mm_w1 = xavier((2 * HID, HID))
    p['mm_w1a'] = mm_w1[:HID]      # multiplies h_path_avg
    p['mm_w1b'] = mm_w1[HID:]      # multiplies h_geno_avg
    p['mm_b1'] = zeros((1, HID))
    p['mm_w2'] = xavier((HID, HID))
    p['mm_b2'] = zeros((1, HID))
    # classifier Linear(256, n_classes)
    p['clf_w'] = xavier((HID, N_CLASSES))
    p['clf_b'] = zeros((1, N_CLASSES))
    return p


def prosurv_forward(params, x_path, x_omic):
    """Eval forward, input_modality='path_and_geno' -> logits (B, n_classes)."""
    B = x_path.shape[0]
    # bf16 MXU operands for the dominant matmul (f32 accumulation inside the kernel).
    x_path_bf16 = x_path.astype(jnp.bfloat16)
    path_w_bf16 = params['path_w'].astype(jnp.bfloat16)
    h_path = path_proj_and_pool(x_path_bf16, path_w_bf16, params['path_b'],
                                params['path_gamma'], params['path_beta'])
    logits = tail_fused(h_path, x_omic.reshape(B, -1), params)
    return logits


if __name__ == "__main__":
    key = jax.random.PRNGKey(0)
    k_in, k_par = jax.random.split(key)
    B, N, OMIC = 2, 16, 128
    kx, kg = jax.random.split(k_in)
    x_path = jax.random.normal(kx, (B, N, PATH_IN), jnp.float32)
    x_omic = jax.random.normal(kg, (B, 1, OMIC), jnp.float32)

    params = init_params(k_par, OMIC)
    logits = prosurv_forward(params, x_path, x_omic)
    jax.block_until_ready(logits)
    assert logits.shape == (B, N_CLASSES), logits.shape
    assert bool(jnp.all(jnp.isfinite(logits)))
    print("KERNEL_OK")
</pallas_src>

<mosaic_0001>
module attributes {stable_mosaic.version = 11 : i64} {
  func.func @_path_proj_pool_kernel(%arg0: i32, %arg1: i32, %arg2: memref<1x16x1024xbf16, #tpu.memory_space<vmem>>, %arg3: memref<1024x256xbf16, #tpu.memory_space<vmem>>, %arg4: memref<1x256xf32, #tpu.memory_space<vmem>>, %arg5: memref<1x256xf32, #tpu.memory_space<vmem>>, %arg6: memref<1x256xf32, #tpu.memory_space<vmem>>, %arg7: memref<1x1x256xf32, #tpu.memory_space<vmem>>, %arg8: memref<1x256xf32, #tpu.memory_space<vmem>>) attributes {dimension_semantics = [#tpu.dimension_semantics<parallel>, #tpu.dimension_semantics<arbitrary>], iteration_bounds = array<i64: 2, 1>, scalar_prefetch = 0 : i64, scratch_operands = 1 : i64, tpu.core_type = #tpu.core_type<tc>, window_params = [{transform_indices = @transform_0, window_bounds = array<i64: 1, 16, 1024>}, {pipeline_mode = #tpu.pipeline_mode<synchronous>, transform_indices = @transform_1, window_bounds = array<i64: 1024, 256>}, {pipeline_mode = #tpu.pipeline_mode<synchronous>, transform_indices = @transform_2, window_bounds = array<i64: 1, 256>}, {pipeline_mode = #tpu.pipeline_mode<synchronous>, transform_indices = @transform_3, window_bounds = array<i64: 1, 256>}, {pipeline_mode = #tpu.pipeline_mode<synchronous>, transform_indices = @transform_4, window_bounds = array<i64: 1, 256>}, {transform_indices = @transform_5, window_bounds = array<i64: 1, 1, 256>}]} {
    %c0_i32 = arith.constant 0 : i32
    %0 = arith.cmpi eq, %arg1, %c0_i32 : i32
    %1 = arith.extui %0 : i1 to i32
    %c0_i32_0 = arith.constant 0 : i32
    %2 = arith.cmpi ne, %1, %c0_i32_0 : i32
    scf.if %2 {
      %cst_24 = arith.constant 0.000000e+00 : f32
      %44 = vector.broadcast %cst_24 : f32 to vector<1x256xf32>
      %c0_25 = arith.constant 0 : index
      %c0_26 = arith.constant 0 : index
      %45 = vector.load %arg8[%c0_25, %c0_26] : memref<1x256xf32, #tpu.memory_space<vmem>>, vector<1x256xf32>
      tpu.vector_store %arg8[%c0_25, %c0_26], %44 {strides = array<i32>} : memref<1x256xf32, #tpu.memory_space<vmem>>, vector<1x256xf32>,
    } else {
    }
    %c0 = arith.constant 0 : index
    %c0_1 = arith.constant 0 : index
    %c0_2 = arith.constant 0 : index
    %3 = vector.load %arg2[%c0, %c0_1, %c0_2] : memref<1x16x1024xbf16, #tpu.memory_space<vmem>>, vector<1x16x1024xbf16>
    %4 = vector.shape_cast %3 : vector<1x16x1024xbf16> to vector<16x1024xbf16>
    %c0_3 = arith.constant 0 : index
    %c0_4 = arith.constant 0 : index
    %5 = vector.load %arg3[%c0_3, %c0_4] : memref<1024x256xbf16, #tpu.memory_space<vmem>>, vector<1024x256xbf16>
    %cst = arith.constant dense<0.000000e+00> : vector<16x256xf32>
    %6 = tpu.matmul %4, %5, %cst {dimension_numbers = #tpu.dot_dimension_numbers<[1], [0], [0], [1], [0, 0, 1, 1], [], []>} : vector<16x1024xbf16>, vector<1024x256xbf16>, vector<16x256xf32> -> vector<16x256xf32>
    %c0_5 = arith.constant 0 : index
    %c0_6 = arith.constant 0 : index
    %7 = vector.load %arg4[%c0_5, %c0_6] : memref<1x256xf32, #tpu.memory_space<vmem>>, vector<1x256xf32>
    %8 = vector.broadcast %7 : vector<1x256xf32> to vector<16x256xf32>
    %9 = arith.addf %6, %8 : vector<16x256xf32>
    %cst_7 = arith.constant 0.000000e+00 : f32
    %10 = vector.broadcast %cst_7 : f32 to vector<16x256xf32>
    %11 = arith.maximumf %9, %10 : vector<16x256xf32>
    %cst_8 = arith.constant dense<0.000000e+00> : vector<16xf32>
    %12 = vector.multi_reduction <add>, %11, %cst_8 [1] : vector<16x256xf32> to vector<16xf32>
    %13 = vector.shape_cast %12 : vector<16xf32> to vector<16x1xf32>
    %cst_9 = arith.constant 3.906250e-03 : f32
    %14 = vector.broadcast %cst_9 : f32 to vector<16x1xf32>
    %15 = arith.mulf %13, %14 : vector<16x1xf32>
    %16 = arith.mulf %11, %11 : vector<16x256xf32>
    %cst_10 = arith.constant dense<0.000000e+00> : vector<16xf32>
    %17 = vector.multi_reduction <add>, %16, %cst_10 [1] : vector<16x256xf32> to vector<16xf32>
    %18 = vector.shape_cast %17 : vector<16xf32> to vector<16x1xf32>
    %cst_11 = arith.constant 3.906250e-03 : f32
    %19 = vector.broadcast %cst_11 : f32 to vector<16x1xf32>
    %20 = arith.mulf %18, %19 : vector<16x1xf32>
    %21 = arith.mulf %15, %15 : vector<16x1xf32>
    %22 = arith.subf %20, %21 : vector<16x1xf32>
    %23 = vector.broadcast %15 : vector<16x1xf32> to vector<16x256xf32>
    %24 = arith.subf %11, %23 : vector<16x256xf32>
    %cst_12 = arith.constant 9.99999974E-6 : f32
    %25 = vector.broadcast %cst_12 : f32 to vector<16x1xf32>
    %26 = arith.addf %22, %25 : vector<16x1xf32>
    %27 = math.rsqrt %26 : vector<16x1xf32>
    %28 = vector.broadcast %27 : vector<16x1xf32> to vector<16x256xf32>
    %29 = arith.mulf %24, %28 : vector<16x256xf32>
    %c0_13 = arith.constant 0 : index
    %c0_14 = arith.constant 0 : index
    %30 = vector.load %arg5[%c0_13, %c0_14] : memref<1x256xf32, #tpu.memory_space<vmem>>, vector<1x256xf32>
    %31 = vector.broadcast %30 : vector<1x256xf32> to vector<16x256xf32>
    %32 = arith.mulf %29, %31 : vector<16x256xf32>
    %c0_15 = arith.constant 0 : index
    %c0_16 = arith.constant 0 : index
    %33 = vector.load %arg6[%c0_15, %c0_16] : memref<1x256xf32, #tpu.memory_space<vmem>>, vector<1x256xf32>
    %34 = vector.broadcast %33 : vector<1x256xf32> to vector<16x256xf32>
    %35 = arith.addf %32, %34 : vector<16x256xf32>
    %c0_17 = arith.constant 0 : index
    %c0_18 = arith.constant 0 : index
    %36 = vector.load %arg8[%c0_17, %c0_18] : memref<1x256xf32, #tpu.memory_space<vmem>>, vector<1x256xf32>
    %cst_19 = arith.constant dense<0.000000e+00> : vector<256xf32>
    %37 = vector.multi_reduction <add>, %35, %cst_19 [0] : vector<16x256xf32> to vector<256xf32>
    %38 = vector.shape_cast %37 : vector<256xf32> to vector<1x256xf32>
    %39 = arith.addf %36, %38 : vector<1x256xf32>
    %c0_20 = arith.constant 0 : index
    %c0_21 = arith.constant 0 : index
    %40 = vector.load %arg8[%c0_20, %c0_21] : memref<1x256xf32, #tpu.memory_space<vmem>>, vector<1x256xf32>
    tpu.vector_store %arg8[%c0_20, %c0_21], %39 {strides = array<i32>} : memref<1x256xf32, #tpu.memory_space<vmem>>, vector<1x256xf32>,
    %c0_i32_22 = arith.constant 0 : i32
    %41 = arith.cmpi eq, %arg1, %c0_i32_22 : i32
    %42 = arith.extui %41 : i1 to i32
    %c0_i32_23 = arith.constant 0 : i32
    %43 = arith.cmpi ne, %42, %c0_i32_23 : i32
    scf.if %43 {
      %c0_24 = arith.constant 0 : index
      %c0_25 = arith.constant 0 : index
      %44 = vector.load %arg8[%c0_24, %c0_25] : memref<1x256xf32, #tpu.memory_space<vmem>>, vector<1x256xf32>
      %cst_26 = arith.constant 6.250000e-02 : f32
      %45 = vector.broadcast %cst_26 : f32 to vector<1x256xf32>
      %46 = arith.mulf %44, %45 : vector<1x256xf32>
      %c0_27 = arith.constant 0 : index
      %c0_28 = arith.constant 0 : index
      %c0_29 = arith.constant 0 : index
      %47 = vector.load %arg7[%c0_27, %c0_28, %c0_29] : memref<1x1x256xf32, #tpu.memory_space<vmem>>, vector<1x1x256xf32>
      %48 = vector.shape_cast %47 : vector<1x1x256xf32> to vector<1x256xf32>
      %49 = vector.shape_cast %46 : vector<1x256xf32> to vector<1x1x256xf32>
      tpu.vector_store %arg7[%c0_27, %c0_28, %c0_29], %49 {strides = array<i32>} : memref<1x1x256xf32, #tpu.memory_space<vmem>>, vector<1x1x256xf32>,
    } else {
    }
    return
  }
  func.func @transform_0(%arg0: i32, %arg1: i32) -> (i32, i32, i32) {
    %c0_i32 = arith.constant 0 : i32
    %c0_i32_0 = arith.constant 0 : i32
    return %arg0, %arg1, %c0_i32 : i32, i32, i32
  }
  func.func @transform_1(%arg0: i32, %arg1: i32) -> (i32, i32) {
    %c0_i32 = arith.constant 0 : i32
    %c0_i32_0 = arith.constant 0 : i32
    %c0_i32_1 = arith.constant 0 : i32
    return %c0_i32, %c0_i32_0 : i32, i32
  }
  func.func @transform_2(%arg0: i32, %arg1: i32) -> (i32, i32) {
    %c0_i32 = arith.constant 0 : i32
    %c0_i32_0 = arith.constant 0 : i32
    %c0_i32_1 = arith.constant 0 : i32
    return %c0_i32, %c0_i32_0 : i32, i32
  }
  func.func @transform_3(%arg0: i32, %arg1: i32) -> (i32, i32) {
    %c0_i32 = arith.constant 0 : i32
    %c0_i32_0 = arith.constant 0 : i32
    %c0_i32_1 = arith.constant 0 : i32
    return %c0_i32, %c0_i32_0 : i32, i32
  }
  func.func @transform_4(%arg0: i32, %arg1: i32) -> (i32, i32) {
    %c0_i32 = arith.constant 0 : i32
    %c0_i32_0 = arith.constant 0 : i32
    %c0_i32_1 = arith.constant 0 : i32
    return %c0_i32, %c0_i32_0 : i32, i32
  }
  func.func @transform_5(%arg0: i32, %arg1: i32) -> (i32, i32, i32) {
    %c0_i32 = arith.constant 0 : i32
    %c0_i32_0 = arith.constant 0 : i32
    %c0_i32_1 = arith.constant 0 : i32
    return %arg0, %c0_i32, %c0_i32_0 : i32, i32, i32
  }
}

</mosaic_0001>

<bundles_post_ra>
// kernel: tpu_custom_call.1
= control target key start
LH: loop header
LB: loop body
LE: loop exit
PB: predicated region body
PF: predicated region fallthrough
CT: control target
= control target key end

     0   :  { %10 = vsyncpa [#allocation4], 0  ;;  %s2417_s0 = inlined_call_operand.hbm [shape: bf16[2,16,1024], index: 0, kind: input, shape index: {}]   ;;  %s2418_s1 = inlined_call_operand.hbm [shape: bf16[1024,256], index: 1, kind: input, shape index: {}]   ;;  %s2419_s2 = inlined_call_operand.vmem [shape: f32[1,256], index: 2, kind: input, shape index: {}]   ;;  %s2420_s3 = inlined_call_operand.vmem [shape: f32[1,256], index: 3, kind: input, shape index: {}]   ;;  %s2421_s4 = inlined_call_operand.vmem [shape: f32[1,256], index: 4, kind: input, shape index: {}]   ;;  %s2422_s5 = inlined_call_operand.hbm [shape: f32[2,1,256], index: 5, kind: output, shape index: {}]  }
   0x1   :  { %12 = vsyncpa [#allocation4 + $0x1], 0 }
   0x2   :  { %13 = vsyncpa [#allocation7], 0 }
   0x3   :  { %14 = vsyncpa [#allocation5], 0 }
   0x4   :  { %16 = vsyncpa [#allocation5 + $0x1], 0  ;;  %s2139_s18 = smov 0   ;;  %s2141_s19 = smov 0  }
   0x5   :  { %s2143_s20 = smov 0   ;;  %s2145_s21 = smov 0  }
   0x6   :  { %s2147_s22 = smov 0   ;;  %s2149_s23 = smov 0  }
   0x7 LB: > { %s1508_s24 = sadd.s32 4294967295, %s2098_s23   ;;  %s1509_s25 = sadd.s32 4294967294, %s2098_s23   ;;  %s2098_s23 = sphi %s2149_s23, %s22_s23   ;;  %s2094_s22 = sphi %s2147_s22, %s2448_s22   ;;  %s2090_s21 = sphi %s2145_s21, %s2447_s21   ;;  %s2086_s20 = sphi %s2143_s20, %s2446_s20   ;;  %s2082_s19 = sphi %s2141_s19, %s2445_s19   ;;  %s2078_s18 = sphi %s2139_s18, %s2444_s18  }
   0x8   : > { %p56_p0 = scmp.ne.s32.totalorder %s2082_s19, %s2078_s18  ;;  %p2173_p1 = scmp.eq.s32.totalorder %s1508_s24, 0 }
   0x9   : > { %p2177_p2 = scmp.eq.s32.totalorder %s1508_s24, 1  ;;  %p170_p3 = scmp.eq.s32.totalorder %s1509_s25, 1 }
   0xa   : > { %s2427_s26 = scalar_select %p2173_p1, 1, 0 }
   0xb   : > { %s2428_s27 = scalar_select %p2177_p2, 1, 0 }
   0xc   : > { %p2183_p4 = por %p2173_p1, %p56_p0  ;;  %p1510_p5 = scmp.ge.s32.totalorder %s2098_s23, 1 }
   0xd   : > { %p2188_p6 = por %p170_p3, %p56_p0  ;;  %p177_p7 = scmp.lt.s32.totalorder %s2098_s23, 3 }
   0xe   : > { %s2429_s28 = scalar_select %p2183_p4, 1, 0 }
   0xf   : > { %s2430_s29 = scalar_select %p2188_p6, 1, 0 }
  0x10   : > { %p2193_p8 = pnand %p1510_p5, %p177_p7  ;;  %s2100_s6 = smov [#allocation6]  }
  0x11   : > { %s189_s7 = sshll.u32 %s2100_s6, 4  ;;  %s34_s9 = sadd.s32 1, %s2094_s22  ;;  %s190_s7 = int_to_ptr.vmem [resolvable:$true] %s189_s7 }
  0x12   : > { %s2431_s30 = scalar_select %p2193_p8, 1, 0 }
  0x13   : > { %p1687_p9 = pneg %p2193_p8  ;;  %s1954_s12 = scalar_lea.hbm %s2418_s1, 16384 }
  0x14   : > { %p1955_p12 = scmp.ne.s32.totalorder %s2418_s1, %s1954_s12  ;;  %p1961_p5 = scmp.lt.u32.totalorder %s1954_s12, %s2418_s1 }
  0x15   : > { %p2202_p11 = pnand %p1687_p9, %p2173_p1 }
  0x17   : > { %p1956_p13 = pneg %p2202_p11 }
  0x19   : > { %p1957_p0 = pnand %p1956_p13, %p1955_p12 }
  0x1b   : > { %p1958_p3 = pneg %p1957_p0 }
  0x1d   : > { %p1963_p7 = pnand %p1961_p5, %p1958_p3 }
  0x1f   : > { %1966 = shalt.err (!%p1963_p7)
}
  0x20   : > { %s1967_s17 = scalar_lea.vmem %s190_s7, 16384  ;;  %p1975_p1 = scmp.lt.s32.totalorder %s190_s7, %s190_s7 }
  0x21   : > { %p1968_p9 = scmp.ne.s32.totalorder %s190_s7, %s1967_s17  ;;  %p1976_p4 = scmp.lt.s32.totalorder %s1967_s17, %s1967_s17 }
  0x23   : > { %p1970_p10 = pnand %p1968_p9, %p1956_p13  ;;  %p1977_p8 = por %p1976_p4, %p1975_p1 }
  0x25   : > { %p1971_p6 = pneg %p1970_p10 }
  0x27   : > { %p1978_p2 = pnand %p1977_p8, %p1971_p6 }
  0x29   : > { %1981 = shalt.err (!%p1978_p2)
}
  0x2a   : > { %s2101_s24 = smov 128   ;;  %s2102_s25 = smov 8  }
  0x2b   : > { %1690 = dma.hbm_to_vmem [thread:$0]  (!%p2202_p11), %s2418_s1, 16384, %s190_s7, [#allocation7], %s2101_s24, %s2101_s24, %s2102_s25  }
  0x2c   : > { %p36_p1 = scmp.ge.s32.totalorder %s34_s9, 2  ;;  %s43_s11 = sadd.s32 1, %s2086_s20 }
  0x2d   : > { %p50_p2 = scmp.ne.s32.totalorder %s2086_s20, %s2082_s19  ;;  %p51_p4 = scmp.eq.s32.totalorder %s2098_s23, 0 }
  0x2e   : > { %s2450_s9 = smov (%p36_p1, %s34_s9), 0  ;;  %p2434_p8 = scmp.ne.s32.totalorder %s2428_s27, 0 }
  0x2f   : > { %p2229_p6 = por %p51_p4, %p50_p2  ;;  %s38_s8 = ssub.s32 %s2094_s22, %s2450_s9 }
  0x30   : > { %p2235_p10 = por %p2434_p8, %p50_p2  ;;  %p1700_p12 = scmp.lt.s32.totalorder %s2098_s23, 2 }
  0x31   : > { %p41_p11 = scmp.eq.s32.totalorder %s38_s8, 0  ;;  %s212_s7 = sand.u32 1, %s2086_s20  }
  0x32   : > { %s1513_s14 = sshll.u32 %s212_s7, 6  ;;  %s1661_s16 = sshll.u32 %s2094_s22, 10 }
  0x33   : > { %s2244_s15 = scalar_select %p41_p11, %s2086_s20, %s43_s11  }
  0x34   : > { %s2250_s25 = scalar_lea.hbm %s2417_s0, %s1661_s16  ;;  %s216_s27 = scalar_lea.vmem [#allocation3], %s1513_s14 }
  0x35   : > { %s226_s6 = sshll.u32 %s216_s27, 4  ;;  %p2256_p13 = pnand %p1700_p12, %p2229_p6  ;;  %s2252_s6 = int_to_ptr.vmem [resolvable:$true] %s226_s6 }
  0x36   : > { %s2260_s11 = scalar_lea.sflag [#allocation4], %s212_s7  ;;  %s1982_s8 = scalar_lea.hbm %s2250_s25, 1024 }
  0x37   : > { %p1983_p0 = scmp.ne.s32.totalorder %s2250_s25, %s1982_s8  ;;  %p1984_p3 = pneg %p2256_p13 }
  0x38   : > { %s1987_s12 = scalar_lea.hbm %s2417_s0, 2048  ;;  %p1988_p9 = scmp.lt.u32.totalorder %s2250_s25, %s2417_s0 }
  0x39   : > { %p1985_p5 = pnand %p1984_p3, %p1983_p0  ;;  %p1989_p1 = scmp.lt.u32.totalorder %s1987_s12, %s1982_s8 }
  0x3a   : > { %p1991_p4 = scmp.lt.u32.totalorder %s1982_s8, %s2250_s25 }
  0x3b   : > { %p1986_p7 = pneg %p1985_p5  ;;  %p1990_p2 = por %p1989_p1, %p1988_p9 }
  0x3d   : > { %p1992_p6 = por %p1991_p4, %p1990_p2 }
  0x3f   : > { %p1993_p8 = pnand %p1992_p6, %p1986_p7 }
  0x41   : > { %1996 = shalt.err (!%p1993_p8)
}
  0x42   : > { %s1997_s7 = scalar_lea.vmem %s2252_s6, 1024  ;;  %s2103_s27 = smov [#allocation3]  }
  0x43   : > { %p1998_p12 = scmp.ne.s32.totalorder %s2252_s6, %s1997_s7  ;;  %s2002_s14 = sshll.u32 %s2103_s27, 4  ;;  %s2003_s14 = int_to_ptr.vmem [resolvable:$false] %s2002_s14 }
  0x44   : > { %s2004_s16 = scalar_lea.vmem %s2003_s14, 2048  ;;  %p2005_p5 = scmp.lt.s32.totalorder %s2252_s6, %s2003_s14 }
  0x45   : > { %p2000_p11 = pnand %p1998_p12, %p1984_p3  ;;  %p2006_p9 = scmp.lt.s32.totalorder %s2004_s16, %s1997_s7 }
  0x47   : > { %p2001_p0 = pneg %p2000_p11  ;;  %p2007_p1 = por %p2006_p9, %p2005_p5 }
  0x49   : > { %p2008_p2 = pnand %p2007_p1, %p2001_p0 }
  0x4b   : > { %2011 = shalt.err (!%p2008_p2)
}
  0x4c   : > { %s2104_s8 = smov 512   ;;  %s2105_s12 = smov 32  }
  0x4d   : > { %1694 = dma.hbm_to_vmem [thread:$0]  (!%p2256_p13), %s2250_s25, 1024, %s2252_s6, %s2260_s11, %s2104_s8, %s2104_s8, %s2105_s12  }
  0x4e   : > { %p2437_p3 = scmp.ne.s32.totalorder %s2431_s30, 0 }
  0x4f   : > { %s2291_s17 = sand.u32 (!%p2437_p3), 1, %s2082_s19   ;;  %p2438_p7 = scmp.ne.s32.totalorder (!%p2437_p3), %s2429_s28, 0 }
  0x50   : > { %238 = sbr.rel (%p2437_p3) target bundleno = 658 (0x292), region = 40  ;;  %s1517_s24 = sshll.u32 (!%p2437_p3), %s2291_s17, 6 }
  0x51   : > { %s241_s7 = scalar_lea.sflag (!%p2437_p3), [#allocation4], %s2291_s17  ;;  %s2295_s27 = scalar_lea.vmem (!%p2437_p3), [#allocation3], %s1517_s24 }
  0x57   : > { %2065 = dma.done.wait (%p2438_p7), %s241_s7, 1024  }
  0x58   : > { %2067 = vsyncadd (%p2438_p7), %s241_s7, 4294966272  ;;  %p2439_p13 = scmp.ne.s32.totalorder %s2427_s26, 0 }
  0x5a   : > { %2069 = dma.done.wait (%p2439_p13), [#allocation7], 16384  }
  0x5b   : > { %2071 = vsyncadd (%p2439_p13), [#allocation7], 4294950912  ;;  %v1758_v0 = vld [vmem:[#allocation6 + $0x4] ss:$8 sps:$4 sm:$0xff]   ;;  %v1762_v2 = vld [vmem:[#allocation6] ss:$8 sps:$4 sm:$0xff]  }
  0x5c   : > { %v1760_v1 = vld [vmem:[#allocation6 + $0x204] ss:$8 sps:$4 sm:$0xff]   ;;  %1113 = vmatprep.subr.bf16.mxu1 %v1758_v0  ;;  %v1763_v3 = vld [vmem:[#allocation6 + $0x200] ss:$8 sps:$4 sm:$0xff]   ;;  %v1764_v4 = vld [vmem:[#allocation6 + $0x14] ss:$8 sps:$4 sm:$0xff]  }
  0x5d   : > { %1199 = vmatprep.subr.bf16.mxu0 %v1760_v1  ;;  %1114 = vmatpush1.bf16.msra.mxu1 %v1762_v2  ;;  %v1766_v5 = vld [vmem:[#allocation6 + $0x214] ss:$8 sps:$4 sm:$0xff]   ;;  %v1768_v6 = vld [vmem:[#allocation6 + $0x10] ss:$8 sps:$4 sm:$0xff]   ;;  %v1770_v8 = vld [vmem:[#allocation6 + $0x24] ss:$8 sps:$4 sm:$0xff]  }
  0x5e   : > { %1200 = vmatpush1.bf16.msra.mxu0 %v1763_v3  ;;  %1115 = vmatprep.subr.bf16.mxu1 %v1764_v4  ;;  %v1769_v7 = vld [vmem:[#allocation6 + $0x210] ss:$8 sps:$4 sm:$0xff]   ;;  %v1772_v9 = vld [vmem:[#allocation6 + $0x224] ss:$8 sps:$4 sm:$0xff]   ;;  %v1774_v10 = vld [vmem:[#allocation6 + $0x20] ss:$8 sps:$4 sm:$0xff]  }
  0x5f   : > { %1201 = vmatprep.subr.bf16.mxu0 %v1766_v5  ;;  %v1775_v11 = vld [vmem:[#allocation6 + $0x220] ss:$8 sps:$4 sm:$0xff]   ;;  %v1776_v12 = vld [vmem:[#allocation6 + $0x34] ss:$8 sps:$4 sm:$0xff]   ;;  %v1780_v14 = vld [vmem:[#allocation6 + $0x30] ss:$8 sps:$4 sm:$0xff]  }
  0x60   : > { %v1778_v13 = vld [vmem:[#allocation6 + $0x234] ss:$8 sps:$4 sm:$0xff]   ;;  %v1781_v15 = vld [vmem:[#allocation6 + $0x230] ss:$8 sps:$4 sm:$0xff]   ;;  %v1782_v16 = vld [vmem:[#allocation6 + $0x44] ss:$8 sps:$4 sm:$0xff]  }
  0x61   : > { %1116 = vmatpush1.bf16.msra.mxu1 %v1768_v6  ;;  %v1784_v17 = vld [vmem:[#allocation6 + $0x244] ss:$8 sps:$4 sm:$0xff]   ;;  %v1786_v18 = vld [vmem:[#allocation6 + $0x40] ss:$8 sps:$4 sm:$0xff]   ;;  %v1788_v20 = vld [vmem:[#allocation6 + $0x54] ss:$8 sps:$4 sm:$0xff]  }
  0x62   : > { %1202 = vmatpush1.bf16.msra.mxu0 %v1769_v7  ;;  %1117 = vmatprep.subr.bf16.mxu1 %v1770_v8  ;;  %v1787_v19 = vld [vmem:[#allocation6 + $0x240] ss:$8 sps:$4 sm:$0xff]   ;;  %v1790_v21 = vld [vmem:[#allocation6 + $0x254] ss:$8 sps:$4 sm:$0xff]   ;;  %v1792_v22 = vld [vmem:[#allocation6 + $0x50] ss:$8 sps:$4 sm:$0xff]  }
  0x63   : > { %1203 = vmatprep.subr.bf16.mxu0 %v1772_v9  ;;  %v1793_v23 = vld [vmem:[#allocation6 + $0x250] ss:$8 sps:$4 sm:$0xff]   ;;  %v1794_v24 = vld [vmem:[#allocation6 + $0x64] ss:$8 sps:$4 sm:$0xff]   ;;  %v1798_v26 = vld [vmem:[#allocation6 + $0x60] ss:$8 sps:$4 sm:$0xff]  }
  0x64   : > { %v1796_v25 = vld [vmem:[#allocation6 + $0x264] ss:$8 sps:$4 sm:$0xff]   ;;  %v1799_v27 = vld [vmem:[#allocation6 + $0x260] ss:$8 sps:$4 sm:$0xff]   ;;  %v1800_v28 = vld [vmem:[#allocation6 + $0x74] ss:$8 sps:$4 sm:$0xff]  }
  0x65   : > { %1118 = vmatpush1.bf16.msra.mxu1 %v1774_v10  ;;  %v1802_v29 = vld [vmem:[#allocation6 + $0x274] ss:$8 sps:$4 sm:$0xff]   ;;  %v1804_v30 = vld [vmem:[#allocation6 + $0x70] ss:$8 sps:$4 sm:$0xff]   ;;  %v1806_v32 = vld [vmem:[#allocation6 + $0x84] ss:$8 sps:$4 sm:$0xff]  }
  0x66   : > { %1204 = vmatpush1.bf16.msra.mxu0 %v1775_v11  ;;  %1119 = vmatprep.subr.bf16.mxu1 %v1776_v12  ;;  %v1805_v31 = vld [vmem:[#allocation6 + $0x270] ss:$8 sps:$4 sm:$0xff]   ;;  %v1808_v33 = vld [vmem:[#allocation6 + $0x284] ss:$8 sps:$4 sm:$0xff]   ;;  %v1810_v34 = vld [vmem:[#allocation6 + $0x80] ss:$8 sps:$4 sm:$0xff]  }
  0x67   : > { %1205 = vmatprep.subr.bf16.mxu0 %v1778_v13  ;;  %v1811_v35 = vld [vmem:[#allocation6 + $0x280] ss:$8 sps:$4 sm:$0xff]   ;;  %v1812_v36 = vld [vmem:[#allocation6 + $0x94] ss:$8 sps:$4 sm:$0xff]   ;;  %v1816_v38 = vld [vmem:[#allocation6 + $0x90] ss:$8 sps:$4 sm:$0xff]  }
  0x68   : > { %v1814_v37 = vld [vmem:[#allocation6 + $0x294] ss:$8 sps:$4 sm:$0xff]   ;;  %v1817_v39 = vld [vmem:[#allocation6 + $0x290] ss:$8 sps:$4 sm:$0xff]   ;;  %v1818_v40 = vld [vmem:[#allocation6 + $0xa4] ss:$8 sps:$4 sm:$0xff]  }
  0x69   : > { %1120 = vmatpush1.bf16.msra.mxu1 %v1780_v14  ;;  %v1820_v41 = vld [vmem:[#allocation6 + $0x2a4] ss:$8 sps:$4 sm:$0xff]   ;;  %v1822_v42 = vld [vmem:[#allocation6 + $0xa0] ss:$8 sps:$4 sm:$0xff]   ;;  %v1824_v44 = vld [vmem:[#allocation6 + $0xb4] ss:$8 sps:$4 sm:$0xff]  }
  0x6a   : > { %1206 = vmatpush1.bf16.msra.mxu0 %v1781_v15  ;;  %1121 = vmatprep.subr.bf16.mxu1 %v1782_v16  ;;  %v1823_v43 = vld [vmem:[#allocation6 + $0x2a0] ss:$8 sps:$4 sm:$0xff]   ;;  %v1826_v45 = vld [vmem:[#allocation6 + $0x2b4] ss:$8 sps:$4 sm:$0xff]   ;;  %v1828_v46 = vld [vmem:[#allocation6 + $0xb0] ss:$8 sps:$4 sm:$0xff]  }
  0x6b   : > { %1207 = vmatprep.subr.bf16.mxu0 %v1784_v17  ;;  %v1829_v47 = vld [vmem:[#allocation6 + $0x2b0] ss:$8 sps:$4 sm:$0xff]   ;;  %v285_v48 = vld [vmem:[%s2295_s27] sm:$0xff]  ;;  %v1836_v58 = vld [vmem:[#allocation6 + $0xd4] ss:$8 sps:$4 sm:$0xff]   ;;  %s1519_s11 = sshll.u32 %s2291_s17, 1 }
  0x6c   : > { %v289_v49 = vld [vmem:[%s2295_s27 + $0x20] sm:$0xff]  ;;  %v287_v53 = vld [vmem:[%s2295_s27 + $0x10] sm:$0xff]  ;;  %s1662_s14 = sshll.u32 %s2090_s21, 5  ;;  %s274_s16 = scalar_lea.vmem [#allocation8], %s1519_s11 }
  0x6d   : > { %1122 = vmatpush1.bf16.msra.mxu1 %v1786_v18  ;;  %v1830_v50 = vld [vmem:[#allocation6 + $0xc4] ss:$8 sps:$4 sm:$0xff]   ;;  %v1521_v52 = vcombine.high %v285_v48, %v289_v49  ;;  %v291_v54 = vld [vmem:[%s2295_s27 + $0x30] sm:$0xff]  ;;  %v1834_v56 = vld [vmem:[#allocation6 + $0xc0] ss:$8 sps:$4 sm:$0xff]   ;;  %v1520_v8 = vcombine.low %v285_v48, %v289_v49  ;;  %s1417_s8 = sshll.u32 %s274_s16, 4  ;;  %s2366_s7 = scalar_lea.hbm %s2422_s5, %s1662_s14  ;;  %s2368_s8 = int_to_ptr.vmem [resolvable:$true] %s1417_s8 }
  0x6e   : > { %1208 = vmatpush1.bf16.msra.mxu0 %v1787_v19  ;;  %1123 = vmatprep.subr.bf16.mxu1 %v1788_v20  ;;  %v1832_v51 = vld [vmem:[#allocation6 + $0x2c4] ss:$8 sps:$4 sm:$0xff]   ;;  %v1525_v55 = vcombine.high %v287_v53, %v291_v54  ;;  %v1835_v57 = vld [vmem:[#allocation6 + $0x2c0] ss:$8 sps:$4 sm:$0xff]   ;;  %v1838_v59 = vld [vmem:[#allocation6 + $0x2d4] ss:$8 sps:$4 sm:$0xff]   ;;  %v1524_v10 = vcombine.low %v287_v53, %v291_v54 }
  0x6f   : > { %1209 = vmatprep.subr.bf16.mxu0 %v1790_v21  ;;  %1145 = vmatprep.mubr.bf16.mxu1 %v1521_v52  ;;  %v1840_v60 = vld [vmem:[#allocation6 + $0xd0] ss:$8 sps:$4 sm:$0xff]   ;;  %v1842_v62 = vld [vmem:[#allocation6 + $0xe4] ss:$8 sps:$4 sm:$0xff]   ;;  %v1846_v0 = vld [vmem:[#allocation6 + $0xe0] ss:$8 sps:$4 sm:$0xff]  }
  0x70   : > { %1231 = vmatprep.mubr.bf16.mxu0 %v1525_v55  ;;  %v1841_v61 = vld [vmem:[#allocation6 + $0x2d0] ss:$8 sps:$4 sm:$0xff]   ;;  %v1844_v63 = vld [vmem:[#allocation6 + $0x2e4] ss:$8 sps:$4 sm:$0xff]   ;;  %v1847_v1 = vld [vmem:[#allocation6 + $0x2e0] ss:$8 sps:$4 sm:$0xff]  }
  0x71   : > { %1124 = vmatpush1.bf16.msra.mxu1 %v1792_v22  ;;  %v1848_v2 = vld [vmem:[#allocation6 + $0xf4] ss:$8 sps:$4 sm:$0xff]   ;;  %v1852_v4 = vld [vmem:[#allocation6 + $0xf0] ss:$8 sps:$4 sm:$0xff]   ;;  %v1856_v6 = vld [vmem:[#allocation6 + $0x104] ss:$8 sps:$4 sm:$0xff]  }
  0x72   : > { %1210 = vmatpush1.bf16.msra.mxu0 %v1793_v23  ;;  %1125 = vmatprep.subr.bf16.mxu1 %v1794_v24  ;;  %v1850_v3 = vld [vmem:[#allocation6 + $0x2f4] ss:$8 sps:$4 sm:$0xff]   ;;  %v1853_v5 = vld [vmem:[#allocation6 + $0x2f0] ss:$8 sps:$4 sm:$0xff]   ;;  %v1859_v7 = vld [vmem:[#allocation6 + $0x304] ss:$8 sps:$4 sm:$0xff]  }
  0x73   : > { %1211 = vmatprep.subr.bf16.mxu0 %v1796_v25  ;;  %v1854_v9 = vld [vmem:[#allocation6 + $0x100] ss:$8 sps:$4 sm:$0xff]   ;;  %v1862_v12 = vld [vmem:[#allocation6 + $0x114] ss:$8 sps:$4 sm:$0xff]   ;;  %v1860_v14 = vld [vmem:[#allocation6 + $0x110] ss:$8 sps:$4 sm:$0xff]  }
  0x74   : > { %v1857_v11 = vld [vmem:[#allocation6 + $0x300] ss:$8 sps:$4 sm:$0xff]   ;;  %v1865_v13 = vld [vmem:[#allocation6 + $0x314] ss:$8 sps:$4 sm:$0xff]   ;;  %v1863_v15 = vld [vmem:[#allocation6 + $0x310] ss:$8 sps:$4 sm:$0xff]  }
  0x75   : > { %1126 = vmatpush1.bf16.msra.mxu1 %v1798_v26  ;;  %v1868_v16 = vld [vmem:[#allocation6 + $0x124] ss:$8 sps:$4 sm:$0xff]   ;;  %v1866_v18 = vld [vmem:[#allocation6 + $0x120] ss:$8 sps:$4 sm:$0xff]   ;;  %v1874_v20 = vld [vmem:[#allocation6 + $0x134] ss:$8 sps:$4 sm:$0xff]  }
  0x76   : > { %1212 = vmatpush1.bf16.msra.mxu0 %v1799_v27  ;;  %1127 = vmatprep.subr.bf16.mxu1 %v1800_v28  ;;  %v1871_v17 = vld [vmem:[#allocation6 + $0x324] ss:$8 sps:$4 sm:$0xff]   ;;  %v1869_v19 = vld [vmem:[#allocation6 + $0x320] ss:$8 sps:$4 sm:$0xff]   ;;  %v1877_v21 = vld [vmem:[#allocation6 + $0x334] ss:$8 sps:$4 sm:$0xff]  }
  0x77   : > { %1213 = vmatprep.subr.bf16.mxu0 %v1802_v29  ;;  %v1872_v22 = vld [vmem:[#allocation6 + $0x130] ss:$8 sps:$4 sm:$0xff]   ;;  %v1880_v24 = vld [vmem:[#allocation6 + $0x144] ss:$8 sps:$4 sm:$0xff]   ;;  %v1878_v26 = vld [vmem:[#allocation6 + $0x140] ss:$8 sps:$4 sm:$0xff]  }
  0x78   : > { %v1875_v23 = vld [vmem:[#allocation6 + $0x330] ss:$8 sps:$4 sm:$0xff]   ;;  %v1883_v25 = vld [vmem:[#allocation6 + $0x344] ss:$8 sps:$4 sm:$0xff]   ;;  %v1881_v27 = vld [vmem:[#allocation6 + $0x340] ss:$8 sps:$4 sm:$0xff]  }
  0x79   : > { %1128 = vmatpush1.bf16.msra.mxu1 %v1804_v30  ;;  %v1886_v28 = vld [vmem:[#allocation6 + $0x154] ss:$8 sps:$4 sm:$0xff]   ;;  %v1884_v30 = vld [vmem:[#allocation6 + $0x150] ss:$8 sps:$4 sm:$0xff]   ;;  %v1902_v48 = vld [vmem:[#allocation6 + $0x180] ss:$8 sps:$4 sm:$0xff]  }
  0x7a   : > { %1214 = vmatpush1.bf16.msra.mxu0 %v1805_v31  ;;  %1129 = vmatprep.subr.bf16.mxu1 %v1806_v32  ;;  %v1889_v29 = vld [vmem:[#allocation6 + $0x354] ss:$8 sps:$4 sm:$0xff]   ;;  %v1887_v31 = vld [vmem:[#allocation6 + $0x350] ss:$8 sps:$4 sm:$0xff]   ;;  %v1892_v32 = vld [vmem:[#allocation6 + $0x164] ss:$8 sps:$4 sm:$0xff]  }
  0x7b   : > { %1215 = vmatprep.subr.bf16.mxu0 %v1808_v33  ;;  %v1895_v33 = vld [vmem:[#allocation6 + $0x364] ss:$8 sps:$4 sm:$0xff]   ;;  %v1905_v49 = vld [vmem:[#allocation6 + $0x380] ss:$8 sps:$4 sm:$0xff]   ;;  %v1908_v52 = vld [vmem:[#allocation6 + $0x190] ss:$8 sps:$4 sm:$0xff]  }
  0x7c   : > { %v1911_v53 = vld [vmem:[#allocation6 + $0x390] ss:$8 sps:$4 sm:$0xff]   ;;  %v1916_v54 = vld [vmem:[#allocation6 + $0x1a4] ss:$8 sps:$4 sm:$0xff]   ;;  %s2012_s26 = scalar_lea.vmem %s2368_s8, 32  ;;  %s2108_s21 = smov [#allocation8]  }
  0x7d   : > { %1130 = vmatpush1.bf16.msra.mxu1 %v1810_v34  ;;  %v2310_v34 = vld [vmem:[%s2295_s27 + $0x8] sm:$0xff]  ;;  %p2013_p4 = scmp.ne.s32.totalorder %s2368_s8, %s2012_s26  ;;  %s2016_s28 = sshll.u32 %s2108_s21, 4  ;;  %s2017_s28 = int_to_ptr.vmem [resolvable:$false] %s2016_s28 }
  0x7e   : > { %1216 = vmatpush1.bf16.msra.mxu0 %v1811_v35  ;;  %1131 = vmatprep.subr.bf16.mxu1 %v1812_v36  ;;  %v2313_v35 = vld [vmem:[%s2295_s27 + $0x28] sm:$0xff]  ;;  %v2316_v36 = vld [vmem:[%s2295_s27 + $0x18] sm:$0xff]  ;;  %s2018_s30 = scalar_lea.vmem %s2017_s28, 64  ;;  %p2019_p12 = scmp.lt.s32.totalorder %s2368_s8, %s2017_s28 }
  0x7f   : > { %1217 = vmatprep.subr.bf16.mxu0 %v1814_v37  ;;  %v2319_v37 = vld [vmem:[%s2295_s27 + $0x38] sm:$0xff]  ;;  %v1919_v55 = vld [vmem:[#allocation6 + $0x3a4] ss:$8 sps:$4 sm:$0xff]   ;;  %s1403_s27 = scalar_lea.sflag [#allocation5], %s2291_s17  ;;  %p2014_p6 = pnand %p2013_p4, %p2235_p10 }
  0x80   : > { %p2020_p11 = scmp.lt.s32.totalorder %s2018_s30, %s2012_s26 }
  0x81   : > { %1132 = vmatpush1.bf16.msra.mxu1 %v1816_v38  ;;  %v1890_v38 = vld [vmem:[#allocation6 + $0x160] ss:$8 sps:$4 sm:$0xff]   ;;  %p2015_p8 = pneg %p2014_p6 }
  0x82   : > { %1218 = vmatpush1.bf16.msra.mxu0 %v1817_v39  ;;  %1133 = vmatprep.subr.bf16.mxu1 %v1818_v40  ;;  %v1893_v39 = vld [vmem:[#allocation6 + $0x360] ss:$8 sps:$4 sm:$0xff]   ;;  %v1523_v40 = vcombine.high %v2310_v34, %v2313_v35  ;;  %p2021_p0 = por %p2020_p11, %p2019_p12 }
  0x83   : > { %1219 = vmatprep.subr.bf16.mxu0 %v1820_v41  ;;  %v1898_v41 = vld [vmem:[#allocation6 + $0x174] ss:$8 sps:$4 sm:$0xff]  }
  0x84   : > { %p2022_p5 = pnand %p2021_p0, %p2015_p8 }
  0x85   : > { %1134 = vmatpush1.bf16.msra.mxu1 %v1822_v42  ;;  %v1901_v42 = vld [vmem:[#allocation6 + $0x374] ss:$8 sps:$4 sm:$0xff]  }
  0x86   : > { %1220 = vmatpush1.bf16.msra.mxu0 %v1823_v43  ;;  %1135 = vmatprep.subr.bf16.mxu1 %v1824_v44  ;;  %v1527_v43 = vcombine.high %v2316_v36, %v2319_v37  ;;  %v1896_v44 = vld [vmem:[#allocation6 + $0x170] ss:$8 sps:$4 sm:$0xff]  }
  0x87   : > { %1221 = vmatprep.subr.bf16.mxu0 %v1826_v45  ;;  %v1899_v45 = vld [vmem:[#allocation6 + $0x370] ss:$8 sps:$4 sm:$0xff]  }
  0x89   : > { %1136 = vmatpush1.bf16.msra.mxu1 %v1828_v46  ;;  %v1904_v46 = vld [vmem:[#allocation6 + $0x184] ss:$8 sps:$4 sm:$0xff]  }
  0x8a   : > { %1222 = vmatpush1.bf16.msra.mxu0 %v1829_v47  ;;  %1137 = vmatprep.subr.bf16.mxu1 %v1830_v50  ;;  %v1907_v47 = vld [vmem:[#allocation6 + $0x384] ss:$8 sps:$4 sm:$0xff]   ;;  %v1910_v50 = vld [vmem:[#allocation6 + $0x194] ss:$8 sps:$4 sm:$0xff]  }
  0x8b   : > { %1223 = vmatprep.subr.bf16.mxu0 %v1832_v51  ;;  %v1913_v51 = vld [vmem:[#allocation6 + $0x394] ss:$8 sps:$4 sm:$0xff]  }
  0x8d   : > { %1138 = vmatpush1.bf16.msra.mxu1 %v1834_v56  ;;  %v1914_v56 = vld [vmem:[#allocation6 + $0x1a0] ss:$8 sps:$4 sm:$0xff]  }
  0x8e   : > { %1224 = vmatpush1.bf16.msra.mxu0 %v1835_v57  ;;  %1139 = vmatprep.subr.bf16.mxu1 %v1836_v58  ;;  %v1917_v57 = vld [vmem:[#allocation6 + $0x3a0] ss:$8 sps:$4 sm:$0xff]   ;;  %v1922_v58 = vld [vmem:[#allocation6 + $0x1b4] ss:$8 sps:$4 sm:$0xff]  }
  0x8f   : > { %1225 = vmatprep.subr.bf16.mxu0 %v1838_v59  ;;  %v1925_v59 = vld [vmem:[#allocation6 + $0x3b4] ss:$8 sps:$4 sm:$0xff]  }
  0x91   : > { %1140 = vmatpush1.bf16.msra.mxu1 %v1840_v60  ;;  %v1920_v60 = vld [vmem:[#allocation6 + $0x1b0] ss:$8 sps:$4 sm:$0xff]  }
  0x92   : > { %1226 = vmatpush1.bf16.msra.mxu0 %v1841_v61  ;;  %1141 = vmatprep.subr.bf16.mxu1 %v1842_v62  ;;  %v1923_v61 = vld [vmem:[#allocation6 + $0x3b0] ss:$8 sps:$4 sm:$0xff]   ;;  %v1928_v62 = vld [vmem:[#allocation6 + $0x1c4] ss:$8 sps:$4 sm:$0xff]  }
  0x93   : > { %1227 = vmatprep.subr.bf16.mxu0 %v1844_v63  ;;  %v1931_v63 = vld [vmem:[#allocation6 + $0x3c4] ss:$8 sps:$4 sm:$0xff]  }
  0x95   : > { %1142 = vmatpush1.bf16.msra.mxu1 %v1846_v0  ;;  %v1926_v0 = vld [vmem:[#allocation6 + $0x1c0] ss:$8 sps:$4 sm:$0xff]  }
  0x96   : > { %1228 = vmatpush1.bf16.msra.mxu0 %v1847_v1  ;;  %1143 = vmatprep.subr.bf16.mxu1 %v1848_v2  ;;  %v1929_v1 = vld [vmem:[#allocation6 + $0x3c0] ss:$8 sps:$4 sm:$0xff]   ;;  %v1934_v2 = vld [vmem:[#allocation6 + $0x1d4] ss:$8 sps:$4 sm:$0xff]  }
  0x97   : > { %1229 = vmatprep.subr.bf16.mxu0 %v1850_v3  ;;  %v1937_v3 = vld [vmem:[#allocation6 + $0x3d4] ss:$8 sps:$4 sm:$0xff]  }
  0x99   : > { %1144 = vmatpush1.bf16.msra.mxu1 %v1852_v4  ;;  %v1932_v4 = vld [vmem:[#allocation6 + $0x1d0] ss:$8 sps:$4 sm:$0xff]  }
  0x9a   : > { %1230 = vmatpush1.bf16.msra.mxu0 %v1853_v5  ;;  %1156 = vmatprep.subr.bf16.mxu1 %v1856_v6  ;;  %v1935_v5 = vld [vmem:[#allocation6 + $0x3d0] ss:$8 sps:$4 sm:$0xff]   ;;  %v1940_v6 = vld [vmem:[#allocation6 + $0x1e4] ss:$8 sps:$4 sm:$0xff]  }
  0x9b   : > { %1242 = vmatprep.subr.bf16.mxu0 %v1859_v7  ;;  %v1943_v7 = vld [vmem:[#allocation6 + $0x3e4] ss:$8 sps:$4 sm:$0xff]  }
  0x9c   : > { %1146 = vmatmul.mubr.bf16.vlgmr.msra.gmra.mrb[0].mxu1 %v1520_v8  ;;  %v1938_v8 = vld [vmem:[#allocation6 + $0x1e0] ss:$8 sps:$4 sm:$0xff]  }
  0x9d   : > { %1232 = vmatmul.mubr.bf16.vlgmr.msra.gmra.mrb[0].mxu0 %v1524_v10  ;;  %1157 = vmatpush1.bf16.msra.mxu1 %v1854_v9  ;;  %v1941_v9 = vld [vmem:[#allocation6 + $0x3e0] ss:$8 sps:$4 sm:$0xff]   ;;  %v1946_v10 = vld [vmem:[#allocation6 + $0x1f4] ss:$8 sps:$4 sm:$0xff]  }
  0x9e   : > { %1243 = vmatpush1.bf16.msra.mxu0 %v1857_v11  ;;  %1158 = vmatprep.subr.bf16.mxu1 %v1862_v12  ;;  %v1949_v11 = vld [vmem:[#allocation6 + $0x3f4] ss:$8 sps:$4 sm:$0xff]   ;;  %v1944_v12 = vld [vmem:[#allocation6 + $0x1f0] ss:$8 sps:$4 sm:$0xff]  }
  0x9f   : > { %1244 = vmatprep.subr.bf16.mxu0 %v1865_v13  ;;  %1188 = vmatprep.mubr.bf16.mxu1 %v1523_v40  ;;  %v1947_v13 = vld [vmem:[#allocation6 + $0x3f0] ss:$8 sps:$4 sm:$0xff]  }
  0xa0   : > { %1274 = vmatprep.mubr.bf16.mxu0 %v1527_v43 }
  0xa1   : > { %1159 = vmatpush1.bf16.msra.mxu1 %v1860_v14  ;;  %v1522_v14 = vcombine.low %v2310_v34, %v2313_v35 }
  0xa2   : > { %1245 = vmatpush1.bf16.msra.mxu0 %v1863_v15  ;;  %1160 = vmatprep.subr.bf16.mxu1 %v1868_v16  ;;  %v1526_v15 = vcombine.low %v2316_v36, %v2319_v37  ;;  %v280_v16 = vlaneseq }
  0xa3   : > { %1246 = vmatprep.subr.bf16.mxu0 %v1871_v17 }
  0xa4   : > { %v2329_v17 = vshrl.u32 %v280_v16, 7  ;;  %vm2342_vm0 = vcmp.lt.s32.totalorder %v280_v16, 256 }
  0xa5   : > { %1161 = vmatpush1.bf16.msra.mxu1 %v1866_v18 }
  0xa6   : > { %1247 = vmatpush1.bf16.msra.mxu0 %v1869_v19  ;;  %1162 = vmatprep.subr.bf16.mxu1 %v1874_v20  ;;  %v2332_v18 = vsub.s32 0, %v2329_v17  ;;  %v421_v19 = vld [vmem:[%s2419_s2] sm:$0x3]  ;;  %v2338_v20 = vsub.s32 1, %v2329_v17 }
  0xa7   : > { %1248 = vmatprep.subr.bf16.mxu0 %v1877_v21 }
  0xa8   : > { %v426_v21 = vrot.slane %v421_v19, %v2332_v18 }
  0xa9   : > { %1163 = vmatpush1.bf16.msra.mxu1 %v1872_v22  ;;  %v430_v22 = vrot.slane %v421_v19, %v2338_v20 }
  0xaa   : > { %1249 = vmatpush1.bf16.msra.mxu0 %v1875_v23  ;;  %1164 = vmatprep.subr.bf16.mxu1 %v1880_v24 }
  0xab   : > { %1250 = vmatprep.subr.bf16.mxu0 %v1883_v25 }
  0xad   : > { %1165 = vmatpush1.bf16.msra.mxu1 %v1878_v26 }
  0xae   : > { %1251 = vmatpush1.bf16.msra.mxu0 %v1881_v27  ;;  %1166 = vmatprep.subr.bf16.mxu1 %v1886_v28 }
  0xaf   : > { %1252 = vmatprep.subr.bf16.mxu0 %v1889_v29 }
  0xb1   : > { %1167 = vmatpush1.bf16.msra.mxu1 %v1884_v30 }
  0xb2   : > { %1253 = vmatpush1.bf16.msra.mxu0 %v1887_v31  ;;  %1168 = vmatprep.subr.bf16.mxu1 %v1892_v32 }
  0xb3   : > { %1254 = vmatprep.subr.bf16.mxu0 %v1895_v33 }
  0xb5   : > { %1169 = vmatpush1.bf16.msra.mxu1 %v1890_v38 }
  0xb6   : > { %1255 = vmatpush1.bf16.msra.mxu0 %v1893_v39  ;;  %1170 = vmatprep.subr.bf16.mxu1 %v1898_v41 }
  0xb7   : > { %1256 = vmatprep.subr.bf16.mxu0 %v1901_v42 }
  0xb9   : > { %1171 = vmatpush1.bf16.msra.mxu1 %v1896_v44 }
  0xba   : > { %1257 = vmatpush1.bf16.msra.mxu0 %v1899_v45  ;;  %1172 = vmatprep.subr.bf16.mxu1 %v1904_v46 }
  0xbb   : > { %1258 = vmatprep.subr.bf16.mxu0 %v1907_v47 }
  0xbd   : > { %1173 = vmatpush1.bf16.msra.mxu1 %v1902_v48 }
  0xbe   : > { %1259 = vmatpush1.bf16.msra.mxu0 %v1905_v49  ;;  %1174 = vmatprep.subr.bf16.mxu1 %v1910_v50 }
  0xbf   : > { %1260 = vmatprep.subr.bf16.mxu0 %v1913_v51 }
  0xc1   : > { %1175 = vmatpush1.bf16.msra.mxu1 %v1908_v52  ;;  %v2106_v52 = vmov 0.0  }
  0xc2   : > { %1261 = vmatpush1.bf16.msra.mxu0 %v1911_v53  ;;  %1176 = vmatprep.subr.bf16.mxu1 %v1916_v54  ;;  %284 = vst.msk [vmem:[#allocation2] sm:$0x3] %vm2342_vm0, %v2106_v52 }
  0xc3   : > { %1262 = vmatprep.subr.bf16.mxu0 %v1919_v55 }
  0xc5   : > { %1177 = vmatpush1.bf16.msra.mxu1 %v1914_v56 }
  0xc6   : > { %1263 = vmatpush1.bf16.msra.mxu0 %v1917_v57  ;;  %1178 = vmatprep.subr.bf16.mxu1 %v1922_v58 }
  0xc7   : > { %1264 = vmatprep.subr.bf16.mxu0 %v1925_v59 }
  0xc9   : > { %1179 = vmatpush1.bf16.msra.mxu1 %v1920_v60 }
  0xca   : > { %1265 = vmatpush1.bf16.msra.mxu0 %v1923_v61  ;;  %1180 = vmatprep.subr.bf16.mxu1 %v1928_v62 }
  0xcb   : > { %1266 = vmatprep.subr.bf16.mxu0 %v1931_v63 }
  0xcd   : > { %1181 = vmatpush1.bf16.msra.mxu1 %v1926_v0 }
  0xce   : > { %1267 = vmatpush1.bf16.msra.mxu0 %v1929_v1  ;;  %1182 = vmatprep.subr.bf16.mxu1 %v1934_v2 }
  0xcf   : > { %1268 = vmatprep.subr.bf16.mxu0 %v1937_v3  ;;  %v1325_v3 = vld [vmem:[%s2420_s3] sm:$0x3] }
  0xd1   : > { %1183 = vmatpush1.bf16.msra.mxu1 %v1932_v4 }
  0xd2   : > { %1269 = vmatpush1.bf16.msra.mxu0 %v1935_v5  ;;  %1184 = vmatprep.subr.bf16.mxu1 %v1940_v6 }
  0xd3   : > { %1270 = vmatprep.subr.bf16.mxu0 %v1943_v7  ;;  %v1330_v7 = vrot.slane %v1325_v3, %v2332_v18 }
  0xd5   : > { %1185 = vmatpush1.bf16.msra.mxu1 %v1938_v8  ;;  %v1341_v8 = vld [vmem:[%s2421_s4] sm:$0x3] }
  0xd6   : > { %1271 = vmatpush1.bf16.msra.mxu0 %v1941_v9  ;;  %1186 = vmatprep.subr.bf16.mxu1 %v1946_v10  ;;  %v1334_v9 = vrot.slane %v1325_v3, %v2338_v20  ;;  %v1350_v16 = vrot.slane %v1341_v8, %v2338_v20 }
  0xd7   : > { %1272 = vmatprep.subr.bf16.mxu0 %v1949_v11 }
  0xd9   : > { %1187 = vmatpush1.bf16.msra.mxu1 %v1944_v12 }
  0xda   : > { %1273 = vmatpush1.bf16.msra.mxu0 %v1947_v13 }
  0xdc   : > { %1189 = vmatmul.mubr.bf16.vlgmr.msra.gmra.mrb[0].mxu1 %v1522_v14 }
  0xdd   : > { %1275 = vmatmul.mubr.bf16.vlgmr.msra.gmra.mrb[0].mxu0 %v1526_v15  ;;  %v1346_v15 = vrot.slane %v1341_v8, %v2332_v18 }
 0x1af   : > { %v1190_v23 = vpop.f32.mrb[0].mxu1 }
 0x1b0   : > { %v1276_v24 = vpop.f32.mrb[0].mxu0  ;;  %v1663_v25 = vadd.f32 %v1190_v23, %v426_v21  ;;  %v1192_v26 = vpop.f32.mrb[1].mxu1 }
 0x1b1   : > { %v1278_v27 = vpop.f32.mrb[1].mxu0  ;;  %v1665_v28 = vadd.f32 %v1192_v26, %v430_v22  ;;  %v1194_v29 = vpop.f32.mrb[2].mxu1 }
 0x1b2   : > { %v1280_v30 = vpop.f32.mrb[2].mxu0  ;;  %v1664_v31 = vadd.f32 %v1663_v25, %v1276_v24  ;;  %v1667_v32 = vadd.f32 %v1194_v29, %v426_v21  ;;  %v1196_v33 = vpop.f32.mrb[3].mxu1 }
 0x1b3   : > { %v1282_v34 = vpop.f32.mrb[3].mxu0  ;;  %v1666_v35 = vadd.f32 %v1665_v28, %v1278_v27  ;;  %v1669_v36 = vadd.f32 %v1196_v33, %v430_v22 }
 0x1b4   : > { %v1285_v37 = vmax.f32 %v1664_v31, 0.0  ;;  %v1668_v38 = vadd.f32 %v1667_v32, %v1280_v30 }
 0x1b5   : > { %v1286_v39 = vmax.f32 %v1666_v35, 0.0  ;;  %v1670_v40 = vadd.f32 %v1669_v36, %v1282_v34  ;;  %v2107_v34 = vmov 1966171168  }
 0x1b6   : > { %v1287_v41 = vmax.f32 %v1668_v38, 0.0  ;;  %v1297_v42 = vmul.f32 %v1285_v37, %v1285_v37  ;;  %v1376_v35 = vunpack.c.l.s4 %v2107_v34 }
 0x1b7   : > { %v1288_v43 = vmax.f32 %v1670_v40, 0.0  ;;  %v1289_v44 = vadd.f32 %v1286_v39, %v1285_v37  ;;  %v1298_v45 = vmul.f32 %v1286_v39, %v1286_v39 }
 0x1b8   : > { %v1299_v47 = vmul.f32 %v1287_v41, %v1287_v41  ;;  %v1377_v38 = vunpack.c.0.s8 %v1376_v35 }
 0x1b9   : > { %1290 = vadd.xlane.f32.xlu0 %v1289_v44  ;;  %v1301_v46 = vadd.f32 %v1298_v45, %v1297_v42  ;;  %v1300_v48 = vmul.f32 %v1288_v43, %v1288_v43  ;;  %v1292_v49 = vadd.f32 %v1288_v43, %v1287_v41 }
 0x1bb   : > { %1302 = vadd.xlane.f32.xlu1 %v1301_v46  ;;  %v1304_v50 = vadd.f32 %v1300_v48, %v1299_v47  ;;  %v1357_v48 = vld [vmem:[#allocation2] sm:$0x3] }
 0x1bd   : > { %1293 = vadd.xlane.f32.xlu0 %v1292_v49 }
 0x1bf   : > { %1305 = vadd.xlane.f32.xlu1 %v1304_v50 }
 0x246   : > { %v1291_v53 = vpop.xlane.xlu0 %1290 }
 0x247   : > { %v1295_v54 = vmul.f32 0.00390625, %v1291_v53 }
 0x248   : > { %v1303_v55 = vpop.xlane.xlu1 %1302 }
 0x249   : > { %v1307_v56 = vmul.f32 0.00390625, %v1303_v55  ;;  %v1309_v57 = vmul.f32 %v1295_v54, %v1295_v54  ;;  %v1313_v5 = vsub.f32 %v1285_v37, %v1295_v54  ;;  %v1314_v6 = vsub.f32 %v1286_v39, %v1295_v54 }
 0x24a   : > { %v1294_v58 = vpop.xlane.xlu0 %1293 }
 0x24b   : > { %v1311_v59 = vsub.f32 %v1307_v56, %v1309_v57  ;;  %v1296_v60 = vmul.f32 0.00390625, %v1294_v58 }
 0x24c   : > { %v1306_v61 = vpop.xlane.xlu1 %1305 }
 0x24d   : > { %v1317_v62 = vadd.f32 1e-05, %v1311_v59  ;;  %v1308_v63 = vmul.f32 0.00390625, %v1306_v61  ;;  %v1310_v0 = vmul.f32 %v1296_v60, %v1296_v60  ;;  %v1315_v12 = vsub.f32 %v1287_v41, %v1296_v60 }
 0x24e   : > { %v1316_v13 = vsub.f32 %v1288_v43, %v1296_v60  ;;  %v1380_v43 = vsub.s32 %v1377_v38, %v2329_v17 }
 0x24f   : > { %1950 = vrsqrt.f32 %v1317_v62  ;;  %v1312_v1 = vsub.f32 %v1308_v63, %v1310_v0 }
 0x251   : > { %v1318_v2 = vadd.f32 1e-05, %v1312_v1 }
 0x253   : > { %1952 = vrsqrt.f32 %v1318_v2 }
 0x259   : > { %v1951_v4 = vpop.eup %1950 }
 0x25a   : > { %v1321_v10 = vmul.f32 %v1951_v4, %v1313_v5  ;;  %v1322_v11 = vmul.f32 %v1951_v4, %v1314_v6 }
 0x25c   : > { %v1337_v19 = vmul.f32 %v1330_v7, %v1321_v10  ;;  %v1338_v21 = vmul.f32 %v1334_v9, %v1322_v11 }
 0x25d   : > { %v1953_v14 = vpop.eup %1952 }
 0x25e   : > { %v1323_v22 = vmul.f32 %v1953_v14, %v1315_v12  ;;  %v1324_v23 = vmul.f32 %v1953_v14, %v1316_v13  ;;  %v1353_v26 = vadd.f32 %v1346_v15, %v1337_v19  ;;  %v1354_v27 = vadd.f32 %v1350_v16, %v1338_v21 }
 0x260   : > { %v1339_v24 = vmul.f32 %v1330_v7, %v1323_v22  ;;  %v1340_v25 = vmul.f32 %v1334_v9, %v1324_v23 }
 0x262   : > { %v1355_v28 = vadd.f32 %v1346_v15, %v1339_v24  ;;  %v1356_v29 = vadd.f32 %v1350_v16, %v1340_v25 }
 0x264   : > { %v1358_v30 = vadd.f32 %v1355_v28, %v1353_v26  ;;  %v1365_v31 = vadd.f32 %v1356_v29, %v1354_v27 }
 0x266   : > { %v1359_v32 = vrot.slane %v1358_v30, 4  ;;  %v1366_v33 = vrot.slane %v1365_v31, 4 }
 0x268   : > { %v1360_v36 = vadd.f32 %v1359_v32, %v1358_v30  ;;  %v1367_v18 = vadd.f32 %v1366_v33, %v1365_v31 }
 0x26a   : > { %v1361_v20 = vrot.slane %v1360_v36, 2  ;;  %v1368_v37 = vrot.slane %v1367_v18, 2 }
 0x26c   : > { %v1362_v39 = vadd.f32 %v1361_v20, %v1360_v36  ;;  %v1369_v40 = vadd.f32 %v1368_v37, %v1367_v18 }
 0x26e   : > { %v1363_v41 = vrot.slane %v1362_v39, 1  ;;  %v1370_v42 = vrot.slane %v1369_v40, 1 }
 0x270   : > { %v1364_v44 = vadd.f32 %v1363_v41, %v1362_v39  ;;  %v1371_v45 = vadd.f32 %v1370_v42, %v1369_v40 }
 0x272   : > { %v1374_v46 = vcombine.low %v1364_v44, %v1371_v45 }
 0x274   : > { %v1381_v47 = vrot.slane %v1374_v46, %v1380_v43 }
 0x276   : > { %v1388_v49 = vrot.slane %v1381_v47, %v1380_v43 }
 0x278   : > { %v1390_v50 = vadd.f32 %v1388_v49, %v1357_v48 }
 0x27a   : > { %1395 = vst.msk [vmem:[#allocation2] sm:$0x3] %vm2342_vm0, %v1390_v50 }
 0x281   : > { %v1399_v52 = vld [vmem:[#allocation2] sm:$0x3] }
 0x282   : > { %v1400_v53 = vmul.f32 0.0625, %v1399_v52 }
 0x284   : > { %1401 = vst.msk [vmem:[%s274_s16] sm:$0x3] %vm2342_vm0, %v1400_v53 }
 0x285   : > { %2025 = shalt.err (!%p2022_p5)
}
 0x286   : > { %s2026_s17 = scalar_lea.hbm %s2366_s7, 32  ;;  %s2030_s10 = scalar_lea.hbm %s2422_s5, 64 }
 0x287   : > { %p2027_p9 = scmp.ne.s32.totalorder %s2366_s7, %s2026_s17  ;;  %p2031_p3 = scmp.lt.u32.totalorder %s2366_s7, %s2422_s5 }
 0x288   : > { %p2032_p7 = scmp.lt.u32.totalorder %s2030_s10, %s2026_s17  ;;  %p2034_p4 = scmp.lt.u32.totalorder %s2026_s17, %s2366_s7 }
 0x289   : > { %p2028_p1 = pnand %p2027_p9, %p2235_p10 }
 0x28a   : > { %p2033_p13 = por %p2032_p7, %p2031_p3 }
 0x28b   : > { %p2029_p2 = pneg %p2028_p1 }
 0x28c   : > { %p2035_p6 = por %p2034_p4, %p2033_p13 }
 0x28e   : > { %p2036_p8 = pnand %p2035_p6, %p2029_p2 }
 0x290   : > { %2039 = shalt.err (!%p2036_p8)
}
 0x291   : > { %1685 = dma.vmem_to_hbm [thread:$0]  (%p2235_p10), %s2368_s8, 32, %s2366_s7, %s1403_s27  }
 0x292 PF: > { %s1429_s16 = sand.u32 1, %s2078_s18   ;;  %p2442_p12 = scmp.ne.s32.totalorder %s2430_s29, 0 }
 0x293   : > { %p2443_p11 = scmp.ge.s32.totalorder %s2098_s23, 2  ;;  %s1430_s12 = scalar_lea.sflag [#allocation5], %s1429_s16 }
 0x295   : > { %p1696_p0 = pnand %p2443_p11, %p2442_p12 }
 0x297   : > { %2073 = dma.done.wait (!%p1696_p0), %s1430_s12, 32  }
 0x298   : > { %2075 = vsyncadd (!%p1696_p0), %s1430_s12, 4294967264  ;;  %s22_s23 = sadd.s32 1, %s2098_s23   ;;  %s2444_s18 = smov %s2082_s19 }
 0x299   : > { %p19_p5 = scmp.ge.s32.totalorder %s22_s23, 4   ;;  %s2445_s19 = smov %s2086_s20 }
 0x29a   : > { %s2446_s20 = smov %s2244_s15  ;;  %s2447_s21 = smov %s2094_s22 }
 0x29b   : > { %s2448_s22 = smov %s2450_s9  ;;  %21 = sbr.rel (!%p19_p5) target bundleno = 7 (0x7), region = 97 }
 0x2a2   :  { %1435 = vsyncpa [#allocation4], 1 }
 0x2a3   :  { %1437 = vsyncpa [#allocation4 + $0x1], 1 }
 0x2a4   :  { %1438 = vsyncpa [#allocation7], 1 }
 0x2a5   :  { %1439 = vsyncpa [#allocation5], 1 }
 0x2a6   :  { %1441 = vsyncpa [#allocation5 + $0x1], 1 }

</bundles_post_ra>
